<compile_context>
chip_gen: v5e
topology: v5e:2x2
jax: 0.10.0
libtpu: 0.0.40
codegen_flags: <defaults>
</compile_context>

<pallas_src>
import functools

import jax
import jax.numpy as jnp
from jax.experimental import pallas as pl
from jax.experimental.pallas import tpu as pltpu


LANE = 128
TM_DST = 512                         # default dst rows per tile
TK_SRC = 1024                        # default src cols per tile
Z_RESIDENT_BUDGET = 24 * 1024 * 1024   # bytes (incl. 2x buffering) for resident z
VMEM_LIMIT_BYTES = 48 * 1024 * 1024    # explicit scoped-VMEM budget (< v7x 64 MiB)


def _round_up(x, m):
    return (x + m - 1) // m * m


# ------------------------------------------------------------------ pass 1 --
def _proj_kernel(h_ref, w_ref, z_ref, s_ref, *, d_pad):
    # h: (TR, in_pad) bf16, w: (in_pad, d_pad + 128) bf16.
    # Single MXU matmul yields [ z | s_dst | s_src | 0 ... ], f32 accumulation.
    z_ext = jnp.dot(h_ref[...], w_ref[...], preferred_element_type=jnp.float32)
    z_ref[...] = z_ext[:, :d_pad].astype(jnp.bfloat16)   # z (bf16 for aggregation)
    s_ref[...] = z_ext[:, d_pad:]                         # f32 attention scores


# ------------------------------------------------------------------ pass 2 --
def _attn_kernel(sdst_ref, ssrc_ref, adj_ref, z_ref, *rest,
                 use_residual, z_resident, tk, negative_slope):
    if use_residual:
        zres_ref, out_ref, m_ref, l_ref = rest
    else:
        out_ref, m_ref, l_ref = rest
        zres_ref = None

    k = pl.program_id(1)

    @pl.when(k == 0)
    def _init():
        m_ref[...] = jnp.full(m_ref.shape, -1e30, m_ref.dtype)
        l_ref[...] = jnp.zeros(l_ref.shape, l_ref.dtype)
        out_ref[...] = jnp.zeros(out_ref.shape, out_ref.dtype)

    # Edge logits: leaky_relu(s_dst[i] + s_src[j]) over the whole tile
    # (no edge-mask compares/selects in the hot path; masking is a single
    # multiply by the 0/1 adjacency below).
    e = sdst_ref[...] + ssrc_ref[...]                    # (TM,1)+(1,TK) -> (TM,TK)
    e = jnp.where(e > 0, e, negative_slope * e)          # leaky_relu

    m_prev = m_ref[...]
    m_new = jnp.maximum(m_prev, jnp.max(e, axis=-1, keepdims=True))
    corr = jnp.exp(m_prev - m_new)
    p = jnp.exp(e - m_new) * adj_ref[...]                # 0/1 bf16 mask folded in

    if z_resident:
        zc = z_ref[pl.ds(pl.multiple_of(k * tk, tk), tk), :]
    else:
        zc = z_ref[...]

    l_ref[...] = corr * l_ref[...] + jnp.sum(p, axis=-1, keepdims=True)
    # Accumulate directly into the resident output block (f32).
    out_ref[...] = corr * out_ref[...] + jnp.dot(
        p.astype(jnp.bfloat16), zc, preferred_element_type=jnp.float32)
    m_ref[...] = m_new

    @pl.when(k == pl.num_programs(1) - 1)
    def _finalize():
        l = l_ref[...]
        l_safe = jnp.where(l > 0.0, l, 1.0)              # dst rows with no in-edges
        out = out_ref[...] * pl.reciprocal(l_safe, approx=True)
        if use_residual:
            out = out + zres_ref[...].astype(jnp.float32)
        out_ref[...] = out


# ------------------------------------------------------------------ wrapper --
def gat_layer_forward(h, w_fc, w_attn, adj, *, use_residual=False,
                      negative_slope=0.01, tm=None, tk=None,
                      force_stream_z=False):
    """h: (n_src, in_dim); w_fc: (out_dim, in_dim); w_attn: (1, 2*out_dim);
    adj: (n_dst, n_src) mask, adj[i, j] != 0 iff edge src j -> dst i."""
    n_src, in_dim = h.shape
    out_dim = w_fc.shape[0]
    n_dst = adj.shape[0]
    assert adj.shape[1] == n_src
    assert n_dst <= n_src, "DGL block: dst nodes are the first n_dst src nodes"

    f32, bf16 = jnp.float32, jnp.bfloat16

    d_pad = _round_up(out_dim, LANE)            # lane-dense z / output
    in_pad = _round_up(in_dim, LANE)

    # Tile sizes: large by default, shrunk for small graphs to avoid padding
    # waste.  Note for v7x (2 TCs): keep n_dst_pad // tm >= 2 on real graphs
    # so the "parallel" dst axis feeds both cores.
    if tm is None:
        tm = min(TM_DST, _round_up(n_dst, 8))
    if tk is None:
        tk = min(TK_SRC, _round_up(n_src, LANE))
    assert tm % 8 == 0 and tk % LANE == 0

    n_dst_pad = _round_up(n_dst, tm)
    n_src_pad = _round_up(n_src, tk)

    # Fold attention vectors into the projection weight:
    # h @ W_ext = [ z | z.a_dst | z.a_src | 0 ... ]
    w = w_fc.T.astype(f32)                                   # (in_dim, out_dim)
    a_src = w_attn[0, :out_dim].astype(f32)
    a_dst = w_attn[0, out_dim:].astype(f32)
    w_ext = jnp.zeros((in_pad, d_pad + LANE), f32)
    w_ext = w_ext.at[:in_dim, :out_dim].set(w)
    w_ext = w_ext.at[:in_dim, d_pad].set(w @ a_dst)          # s column 0 -> s_dst
    w_ext = w_ext.at[:in_dim, d_pad + 1].set(w @ a_src)      # s column 1 -> s_src
    w_ext_b = w_ext.astype(bf16)

    # Fast path: skip the padded-copy HBM pass when shapes already align.
    if h.shape == (n_src_pad, in_pad):
        h_p = h.astype(bf16)
    else:
        h_p = jnp.zeros((n_src_pad, in_pad), bf16)
        h_p = h_p.at[:n_src, :in_dim].set(h.astype(bf16))

    # ---------------- pass 1: projection (bf16 MXU, f32 accumulate) ---------
    tr = tk
    proj_cost = pl.CostEstimate(
        flops=int(2 * n_src_pad * in_pad * (d_pad + LANE)),
        transcendentals=0,
        bytes_accessed=int(h_p.size * 2 + w_ext_b.size * 2
                           + n_src_pad * d_pad * 2 + n_src_pad * LANE * 4),
    )
    z_p, s_p = pl.pallas_call(
        functools.partial(_proj_kernel, d_pad=d_pad),
        grid=(n_src_pad // tr,),
        in_specs=[
            pl.BlockSpec((tr, in_pad), lambda r: (r, 0)),
            pl.BlockSpec((in_pad, d_pad + LANE), lambda r: (0, 0)),
        ],
        out_specs=[
            pl.BlockSpec((tr, d_pad), lambda r: (r, 0)),
            pl.BlockSpec((tr, LANE), lambda r: (r, 0)),
        ],
        out_shape=[
            jax.ShapeDtypeStruct((n_src_pad, d_pad), bf16),
            jax.ShapeDtypeStruct((n_src_pad, LANE), f32),
        ],
        compiler_params=pltpu.CompilerParams(
            dimension_semantics=("parallel",),
            vmem_limit_bytes=VMEM_LIMIT_BYTES),
        cost_estimate=proj_cost,
    )(h_p, w_ext_b)

    # Attention-score operands in the exact layouts the kernel consumes.
    s_dst_col = jnp.zeros((n_dst_pad, 1), f32).at[:n_dst, 0].set(s_p[:n_dst, 0])
    s_src_row = s_p[:, 1].reshape(1, n_src_pad)

    # bf16 0/1 adjacency mask: halves the dominant HBM->VMEM traffic vs f32.
    # TODO(synk): cache this across layers/epochs; int8/bit-packed on v5e.
    if adj.shape == (n_dst_pad, n_src_pad):
        adj_p = (adj != 0).astype(bf16)
    else:
        adj_p = jnp.zeros((n_dst_pad, n_src_pad), bf16)
        adj_p = adj_p.at[:n_dst, :n_src].set((adj != 0).astype(bf16))

    # Keep z fully resident in VMEM when it fits the budget (DMA'd once).
    z_bytes = n_src_pad * d_pad * 2
    z_resident = (not force_stream_z) and (2 * z_bytes <= Z_RESIDENT_BUDGET)
    if z_resident:
        z_spec = pl.BlockSpec((n_src_pad, d_pad), lambda i, k: (0, 0))
    else:
        z_spec = pl.BlockSpec((tk, d_pad), lambda i, k: (k, 0))

    in_specs = [
        pl.BlockSpec((tm, 1), lambda i, k: (i, 0)),          # s_dst column
        pl.BlockSpec((1, tk), lambda i, k: (0, k)),          # s_src row
        pl.BlockSpec((tm, tk), lambda i, k: (i, k)),         # adj slab (bf16)
        z_spec,                                               # z (src features)
    ]
    inputs = [s_dst_col, s_src_row, adj_p, z_p]
    if use_residual:
        z_dst_p = jnp.zeros((n_dst_pad, d_pad), bf16).at[:n_dst].set(z_p[:n_dst])
        in_specs.append(pl.BlockSpec((tm, d_pad), lambda i, k: (i, 0)))
        inputs.append(z_dst_p)

    # ---------------- pass 2: tiled attention with online softmax -----------
    n_i = n_dst_pad // tm
    n_k = n_src_pad // tk
    z_reads = 1 if z_resident else n_i
    attn_cost = pl.CostEstimate(
        flops=int(2 * n_dst_pad * n_src_pad * d_pad + 8 * n_dst_pad * n_src_pad),
        transcendentals=int(n_dst_pad * n_src_pad),
        bytes_accessed=int(adj_p.size * 2 + z_reads * z_bytes
                           + n_dst_pad * d_pad * 4 + n_dst_pad * 4
                           + n_i * n_src_pad * 4),
    )
    out_p = pl.pallas_call(
        functools.partial(_attn_kernel, use_residual=use_residual,
                          z_resident=z_resident, tk=tk,
                          negative_slope=negative_slope),
        grid=(n_i, n_k),                                     # src (reduction) axis last
        in_specs=in_specs,
        out_specs=pl.BlockSpec((tm, d_pad), lambda i, k: (i, 0)),
        out_shape=jax.ShapeDtypeStruct((n_dst_pad, d_pad), f32),
        scratch_shapes=[
            pltpu.VMEM((tm, 1), f32),        # m  (running max)
            pltpu.VMEM((tm, 1), f32),        # l  (running denominator)
        ],
        compiler_params=pltpu.CompilerParams(
            dimension_semantics=("parallel", "arbitrary"),
            vmem_limit_bytes=VMEM_LIMIT_BYTES),
        cost_estimate=attn_cost,
    )(*inputs)

    return out_p[:n_dst, :out_dim]


def _reference(h, w_fc, w_attn, adj, use_residual=False):
    """Pure-JAX f32 reference with the same dense-GAT semantics."""
    out_dim = w_fc.shape[0]
    n_dst = adj.shape[0]
    z = h @ w_fc.T
    z_dst = z[:n_dst]
    a_src = w_attn[0, :out_dim]
    a_dst = w_attn[0, out_dim:]
    e = z_dst @ a_dst[:, None] + (z @ a_src[:, None]).T
    e = jnp.where(e > 0, e, 0.01 * e)
    mask = adj != 0
    e = jnp.where(mask, e, -1e30)
    p = jnp.exp(e - e.max(axis=-1, keepdims=True))
    p = jnp.where(mask, p, 0.0)
    alpha = p / p.sum(axis=-1, keepdims=True)
    out = alpha @ z
    if use_residual:
        out = out + z_dst
    return out


def _make_inputs(key, n_src, n_dst, in_dim, out_dim):
    k_h, k_w, k_a, k_adj = jax.random.split(key, 4)
    h = jax.random.normal(k_h, (n_src, in_dim), dtype=jnp.float32)
    # Deterministic xavier_normal_-style init with gain = sqrt(2) (relu gain).
    gain = jnp.sqrt(2.0)
    std_fc = gain * jnp.sqrt(2.0 / (in_dim + out_dim))
    w_fc = std_fc * jax.random.normal(k_w, (out_dim, in_dim), dtype=jnp.float32)
    std_attn = gain * jnp.sqrt(2.0 / (2 * out_dim + 1))
    w_attn = std_attn * jax.random.normal(k_a, (1, 2 * out_dim), dtype=jnp.float32)
    # Random block adjacency; guarantee every dst node has >= 1 in-edge
    # (self edge; dst nodes are the first n_dst src nodes, as in DGL blocks).
    adj = (jax.random.uniform(k_adj, (n_dst, n_src)) < 0.3).astype(jnp.float32)
    adj = adj.at[jnp.arange(n_dst), jnp.arange(n_dst)].set(1.0)
    return h, w_fc, w_attn, adj


def _check(out, ref, tag):
    assert out.shape == ref.shape, f"{tag}: shape {out.shape} vs {ref.shape}"
    assert jnp.allclose(out, ref, atol=5e-2, rtol=5e-2), (
        f"{tag}: mismatch vs reference, "
        f"max |diff|={float(jnp.max(jnp.abs(out - ref)))}")


if __name__ == "__main__":
    key = jax.random.PRNGKey(0)
    key_a, key_b = jax.random.split(key, 2)

    # Case A: tiny graph, default (adaptive) tiles, resident-z path,
    # both residual variants.
    n_src, n_dst, in_dim, out_dim = 16, 8, 32, 16
    h, w_fc, w_attn, adj = _make_inputs(key_a, n_src, n_dst, in_dim, out_dim)
    for use_residual in (False, True):
        out = gat_layer_forward(h, w_fc, w_attn, adj, use_residual=use_residual)
        out = jax.block_until_ready(out)
        ref = _reference(h, w_fc, w_attn, adj, use_residual=use_residual)
        _check(out, ref, f"caseA(residual={use_residual})")

    # Case B: larger graph with forced small tiles to exercise the multi-step
    # online softmax (n_k > 1), multiple dst tiles, ragged padding tails and
    # the streamed-z fallback path.
    n_src, n_dst, in_dim, out_dim = 300, 100, 32, 16
    h, w_fc, w_attn, adj = _make_inputs(key_b, n_src, n_dst, in_dim, out_dim)
    out = gat_layer_forward(h, w_fc, w_attn, adj, use_residual=True,
                            tm=32, tk=128, force_stream_z=True)
    out = jax.block_until_ready(out)
    ref = _reference(h, w_fc, w_attn, adj, use_residual=True)
    _check(out, ref, "caseB(multi-tile, streamed z)")

    print("KERNEL_OK")
</pallas_src>

<mosaic_0001>
module attributes {stable_mosaic.version = 11 : i64} {
  func.func @_proj_kernel(%arg0: i32, %arg1: memref<128x128xbf16, #tpu.memory_space<vmem>>, %arg2: memref<128x256xbf16, #tpu.memory_space<vmem>>, %arg3: memref<128x128xbf16, #tpu.memory_space<vmem>>, %arg4: memref<128x128xf32, #tpu.memory_space<vmem>>) attributes {dimension_semantics = [#tpu.dimension_semantics<parallel>], iteration_bounds = array<i64: 1>, scalar_prefetch = 0 : i64, scratch_operands = 0 : i64, tpu.core_type = #tpu.core_type<tc>, window_params = [{transform_indices = @transform_0, window_bounds = array<i64: 128, 128>}, {pipeline_mode = #tpu.pipeline_mode<synchronous>, transform_indices = @transform_1, window_bounds = array<i64: 128, 256>}, {transform_indices = @transform_2, window_bounds = array<i64: 128, 128>}, {transform_indices = @transform_3, window_bounds = array<i64: 128, 128>}]} {
    %c0 = arith.constant 0 : index
    %c0_0 = arith.constant 0 : index
    %0 = vector.load %arg1[%c0, %c0_0] : memref<128x128xbf16, #tpu.memory_space<vmem>>, vector<128x128xbf16>
    %c0_1 = arith.constant 0 : index
    %c0_2 = arith.constant 0 : index
    %1 = vector.load %arg2[%c0_1, %c0_2] : memref<128x256xbf16, #tpu.memory_space<vmem>>, vector<128x256xbf16>
    %cst = arith.constant dense<0.000000e+00> : vector<128x256xf32>
    %2 = tpu.matmul %0, %1, %cst {dimension_numbers = #tpu.dot_dimension_numbers<[1], [0], [0], [1], [0, 0, 1, 1], [], []>} : vector<128x128xbf16>, vector<128x256xbf16>, vector<128x256xf32> -> vector<128x256xf32>
    %3 = vector.extract_strided_slice %2 {offsets = [0, 0], sizes = [128, 128], strides = [1, 1]} : vector<128x256xf32> to vector<128x128xf32>
    %4 = arith.truncf %3 : vector<128x128xf32> to vector<128x128xbf16>
    %c0_3 = arith.constant 0 : index
    %c0_4 = arith.constant 0 : index
    %5 = vector.load %arg3[%c0_3, %c0_4] : memref<128x128xbf16, #tpu.memory_space<vmem>>, vector<128x128xbf16>
    tpu.vector_store %arg3[%c0_3, %c0_4], %4 {strides = array<i32>} : memref<128x128xbf16, #tpu.memory_space<vmem>>, vector<128x128xbf16>,
    %6 = vector.extract_strided_slice %2 {offsets = [0, 128], sizes = [128, 128], strides = [1, 1]} : vector<128x256xf32> to vector<128x128xf32>
    %c0_5 = arith.constant 0 : index
    %c0_6 = arith.constant 0 : index
    %7 = vector.load %arg4[%c0_5, %c0_6] : memref<128x128xf32, #tpu.memory_space<vmem>>, vector<128x128xf32>
    tpu.vector_store %arg4[%c0_5, %c0_6], %6 {strides = array<i32>} : memref<128x128xf32, #tpu.memory_space<vmem>>, vector<128x128xf32>,
    return
  }
  func.func @transform_0(%arg0: i32) -> (i32, i32) {
    %c0_i32 = arith.constant 0 : i32
    %c0_i32_0 = arith.constant 0 : i32
    return %arg0, %c0_i32 : i32, i32
  }
  func.func @transform_1(%arg0: i32) -> (i32, i32) {
    %c0_i32 = arith.constant 0 : i32
    %c0_i32_0 = arith.constant 0 : i32
    %c0_i32_1 = arith.constant 0 : i32
    return %c0_i32, %c0_i32_0 : i32, i32
  }
  func.func @transform_2(%arg0: i32) -> (i32, i32) {
    %c0_i32 = arith.constant 0 : i32
    %c0_i32_0 = arith.constant 0 : i32
    return %arg0, %c0_i32 : i32, i32
  }
  func.func @transform_3(%arg0: i32) -> (i32, i32) {
    %c0_i32 = arith.constant 0 : i32
    %c0_i32_0 = arith.constant 0 : i32
    return %arg0, %c0_i32 : i32, i32
  }
}

</mosaic_0001>

<bundles_post_ra>
// kernel: tpu_custom_call.1
= control target key start
LH: loop header
LB: loop body
LE: loop exit
PB: predicated region body
PF: predicated region fallthrough
CT: control target
= control target key end

     0   :  { %9 = vsyncpa [#allocation3], 0  ;;  %s738_s0 = inlined_call_operand.hbm [shape: bf16[128,128], index: 0, kind: input, shape index: {}]   ;;  %s739_s1 = inlined_call_operand.hbm [shape: bf16[128,256], index: 1, kind: input, shape index: {}]   ;;  %s740_s2 = inlined_call_operand.hbm [shape: bf16[128,128], index: 2, kind: output, shape index: {0}]   ;;  %s741_s3 = inlined_call_operand.hbm [shape: f32[128,128], index: 3, kind: output, shape index: {1}]  }
   0x1   :  { %10 = vsyncpa [#allocation6], 0 }
   0x2   :  { %11 = vsyncpa [#allocation4], 0 }
   0x3   :  { %12 = vsyncpa [#allocation9], 0  ;;  %s17_s14 = sshll.u32 %s738_s0, 4  ;;  %s686_s15 = smov [#allocation2]   ;;  %s18_s14 = int_to_ptr.hbm [resolvable:$true] %s17_s14 }
   0x4   :  { %s19_s16 = sshll.u32 %s686_s15, 4  ;;  %s30_s19 = sshll.u32 %s739_s1, 4  ;;  %s20_s16 = int_to_ptr.vmem [resolvable:$true] %s19_s16  ;;  %s31_s19 = int_to_ptr.hbm [resolvable:$true] %s30_s19 }
   0x5   :  { %s687_s20 = smov 64   ;;  %s688_s21 = smov 4  }
   0x6   :  { %25 = dma.hbm_to_vmem [thread:$0]  %s18_s14, 1024, %s20_s16, [#allocation3], %s687_s20, %s687_s20, %s688_s21  }
   0x7   :  { %s689_s22 = smov [#allocation5]   ;;  %s690_s24 = smov 128  }
   0x8   :  { %s32_s23 = sshll.u32 %s689_s22, 4  ;;  %s691_s0 = smov 8   ;;  %s33_s23 = int_to_ptr.vmem [resolvable:$true] %s32_s23 }
   0x9   :  { %38 = dma.hbm_to_vmem [thread:$0]  %s31_s19, 2048, %s33_s23, [#allocation6], %s690_s24, %s690_s24, %s691_s0  }
   0xa   :  { %678 = dma.done.wait [#allocation3], 1024  }
   0xb   :  { %679 = vsyncadd [#allocation3], 4294966272 }
   0xc   :  { %680 = dma.done.wait [#allocation6], 2048  }
   0xd   :  { %681 = vsyncadd [#allocation6], 4294965248  ;;  %v481_v0 = vld [vmem:[#allocation5 + $0x70] sm:$0xf]  ;;  %v510_v1 = vld [vmem:[#allocation5 + $0x74] sm:$0xf0] }
   0xe   :  { %v509_v2 = vld [vmem:[#allocation5 + $0x74] sm:$0xf]  ;;  %v482_v3 = vor.u32 %v510_v1, %v481_v0  ;;  %v483_v4 = vld [vmem:[#allocation5 + $0x78] sm:$0xf0]  ;;  %v473_v5 = vld [vmem:[#allocation5 + $0x60] sm:$0xf] }
   0xf   :  { %v508_v6 = vld [vmem:[#allocation5 + $0x64] sm:$0xf0]  ;;  %v486_v7 = vor.u32 %v509_v2, %v483_v4  ;;  %v507_v8 = vld [vmem:[#allocation5 + $0x64] sm:$0xf]  ;;  %v475_v9 = vld [vmem:[#allocation5 + $0x68] sm:$0xf0] }
  0x10   :  { %207 = vmatpush.bf16.msra.mxu0 %v482_v3  ;;  %558 = vmatpush.bf16.msra.mxu2 %v482_v3  ;;  %v474_v10 = vor.u32 %v508_v6, %v473_v5  ;;  %v478_v11 = vor.u32 %v507_v8, %v475_v9  ;;  %v465_v12 = vld [vmem:[#allocation5 + $0x50] sm:$0xf]  ;;  %v506_v13 = vld [vmem:[#allocation5 + $0x54] sm:$0xf0]  ;;  %v505_v14 = vld [vmem:[#allocation5 + $0x54] sm:$0xf] }
  0x11   :  { %256 = vmatpush.bf16.msra.mxu1 %v486_v7  ;;  %566 = vmatpush.bf16.msra.mxu3 %v486_v7  ;;  %v467_v15 = vld [vmem:[#allocation5 + $0x58] sm:$0xf0]  ;;  %v466_v16 = vor.u32 %v506_v13, %v465_v12  ;;  %v457_v18 = vld [vmem:[#allocation5 + $0x40] sm:$0xf]  ;;  %v504_v19 = vld [vmem:[#allocation5 + $0x44] sm:$0xf0] }
  0x12   :  { %v470_v17 = vor.u32 %v505_v14, %v467_v15  ;;  %v503_v20 = vld [vmem:[#allocation5 + $0x44] sm:$0xf]  ;;  %v459_v21 = vld [vmem:[#allocation5 + $0x48] sm:$0xf0]  ;;  %v458_v22 = vor.u32 %v504_v19, %v457_v18  ;;  %v449_v24 = vld [vmem:[#allocation5 + $0x30] sm:$0xf] }
  0x13   :  { %v462_v23 = vor.u32 %v503_v20, %v459_v21  ;;  %v502_v25 = vld [vmem:[#allocation5 + $0x34] sm:$0xf0]  ;;  %v501_v26 = vld [vmem:[#allocation5 + $0x34] sm:$0xf]  ;;  %v451_v27 = vld [vmem:[#allocation5 + $0x38] sm:$0xf0] }
  0x14   :  { %208 = vmatpush.bf16.msra.mxu0 %v474_v10  ;;  %559 = vmatpush.bf16.msra.mxu2 %v474_v10  ;;  %v450_v28 = vor.u32 %v502_v25, %v449_v24  ;;  %v454_v29 = vor.u32 %v501_v26, %v451_v27  ;;  %v441_v30 = vld [vmem:[#allocation5 + $0x20] sm:$0xf]  ;;  %v500_v31 = vld [vmem:[#allocation5 + $0x24] sm:$0xf0]  ;;  %v499_v32 = vld [vmem:[#allocation5 + $0x24] sm:$0xf] }
  0x15   :  { %257 = vmatpush.bf16.msra.mxu1 %v478_v11  ;;  %567 = vmatpush.bf16.msra.mxu3 %v478_v11  ;;  %v443_v33 = vld [vmem:[#allocation5 + $0x28] sm:$0xf0]  ;;  %v442_v34 = vor.u32 %v500_v31, %v441_v30  ;;  %v433_v36 = vld [vmem:[#allocation5 + $0x10] sm:$0xf]  ;;  %v498_v37 = vld [vmem:[#allocation5 + $0x14] sm:$0xf0] }
  0x16   :  { %v446_v35 = vor.u32 %v499_v32, %v443_v33  ;;  %v497_v38 = vld [vmem:[#allocation5 + $0x14] sm:$0xf]  ;;  %v435_v39 = vld [vmem:[#allocation5 + $0x18] sm:$0xf0]  ;;  %v434_v40 = vor.u32 %v498_v37, %v433_v36  ;;  %v425_v42 = vld [vmem:[#allocation5] sm:$0xf] }
  0x17   :  { %v438_v41 = vor.u32 %v497_v38, %v435_v39  ;;  %v496_v43 = vld [vmem:[#allocation5 + $0x4] sm:$0xf0]  ;;  %v495_v44 = vld [vmem:[#allocation5 + $0x4] sm:$0xf]  ;;  %v427_v45 = vld [vmem:[#allocation5 + $0x8] sm:$0xf0] }
  0x18   :  { %209 = vmatpush.bf16.msra.mxu0 %v466_v16  ;;  %560 = vmatpush.bf16.msra.mxu2 %v466_v16  ;;  %v426_v46 = vor.u32 %v496_v43, %v425_v42  ;;  %v430_v47 = vor.u32 %v495_v44, %v427_v45  ;;  %v487_v48 = vld [vmem:[#allocation2] sm:$0xff]  ;;  %v488_v50 = vld [vmem:[#allocation2 + $0x8] sm:$0xff]  ;;  %v489_v52 = vld [vmem:[#allocation2 + $0x10] sm:$0xff]  ;;  %s692_s1 = smov [#allocation8]   ;;  %s372_s28 = sshll.u32 %s741_s3, 4  ;;  %s373_s28 = int_to_ptr.hbm [resolvable:$true] %s372_s28 }
  0x19   :  { %258 = vmatpush.bf16.msra.mxu1 %v470_v17  ;;  %568 = vmatpush.bf16.msra.mxu3 %v470_v17  ;;  %v491_v49 = vld [vmem:[#allocation2 + $0x20] sm:$0xff]  ;;  %v492_v51 = vld [vmem:[#allocation2 + $0x28] sm:$0xff]  ;;  %v493_v53 = vld [vmem:[#allocation2 + $0x30] sm:$0xff]  ;;  %s370_s25 = sshll.u32 %s692_s1, 4  ;;  %s693_s29 = smov [#allocation7]   ;;  %s371_s25 = int_to_ptr.vmem [resolvable:$true] %s370_s25 }
  0x1a   :  { %v490_v54 = vld [vmem:[#allocation2 + $0x18] sm:$0xff]  ;;  %s357_s30 = sshll.u32 %s693_s29, 4  ;;  %s359_s6 = sshll.u32 %s740_s2, 4  ;;  %s358_s30 = int_to_ptr.vmem [resolvable:$true] %s357_s30  ;;  %s360_s6 = int_to_ptr.hbm [resolvable:$true] %s359_s6 }
  0x1b   :  { %v494_v55 = vld [vmem:[#allocation2 + $0x38] sm:$0xff] }
  0x1c   :  { %210 = vmatpush.bf16.msra.mxu0 %v458_v22  ;;  %561 = vmatpush.bf16.msra.mxu2 %v458_v22 }
  0x1d   :  { %259 = vmatpush.bf16.msra.mxu1 %v462_v23  ;;  %569 = vmatpush.bf16.msra.mxu3 %v462_v23 }
  0x20   :  { %211 = vmatpush.bf16.msra.mxu0 %v450_v28  ;;  %562 = vmatpush.bf16.msra.mxu2 %v450_v28 }
  0x21   :  { %260 = vmatpush.bf16.msra.mxu1 %v454_v29  ;;  %570 = vmatpush.bf16.msra.mxu3 %v454_v29 }
  0x24   :  { %212 = vmatpush.bf16.msra.mxu0 %v442_v34  ;;  %563 = vmatpush.bf16.msra.mxu2 %v442_v34 }
  0x25   :  { %261 = vmatpush.bf16.msra.mxu1 %v446_v35  ;;  %571 = vmatpush.bf16.msra.mxu3 %v446_v35 }
  0x28   :  { %213 = vmatpush.bf16.msra.mxu0 %v434_v40  ;;  %564 = vmatpush.bf16.msra.mxu2 %v434_v40 }
  0x29   :  { %262 = vmatpush.bf16.msra.mxu1 %v438_v41  ;;  %572 = vmatpush.bf16.msra.mxu3 %v438_v41 }
  0x2c   :  { %214 = vmatpush.bf16.msra.mxu0 %v426_v46  ;;  %565 = vmatpush.bf16.msra.mxu2 %v426_v46 }
  0x2d   :  { %263 = vmatpush.bf16.msra.mxu1 %v430_v47  ;;  %573 = vmatpush.bf16.msra.mxu3 %v430_v47 }
  0x2f   :  { %215 = vmatmul.bf16.vlgmr.msra.gmra.mxu0 %v487_v48  ;;  %235 = vmatmul.bf16.vlgmr.msra.gmra.mxu2 %v491_v49 }
  0x30   :  { %264 = vmatmul.bf16.vlgmr.msra.gmra.mxu1 %v487_v48  ;;  %284 = vmatmul.bf16.vlgmr.msra.gmra.mxu3 %v491_v49 }
  0x3f   :  { %220 = vmatmul.bf16.gmra.mxu0 %v488_v50  ;;  %240 = vmatmul.bf16.gmra.mxu2 %v492_v51 }
  0x40   :  { %269 = vmatmul.bf16.gmra.mxu1 %v488_v50  ;;  %289 = vmatmul.bf16.gmra.mxu3 %v492_v51 }
  0x4f   :  { %225 = vmatmul.bf16.gmra.mxu0 %v489_v52  ;;  %245 = vmatmul.bf16.gmra.mxu2 %v493_v53 }
  0x50   :  { %274 = vmatmul.bf16.gmra.mxu1 %v489_v52  ;;  %294 = vmatmul.bf16.gmra.mxu3 %v493_v53 }
  0x5f   :  { %230 = vmatmul.bf16.gmra.mxu0 %v490_v54  ;;  %250 = vmatmul.bf16.gmra.mxu2 %v494_v55 }
  0x60   :  { %279 = vmatmul.bf16.gmra.mxu1 %v490_v54  ;;  %299 = vmatmul.bf16.gmra.mxu3 %v494_v55 }
  0xac   :  { %v216_v56 = vpop.f32.mrf.mxu0 }
  0xad   :  { %v265_v57 = vpop.f32.mrf.mxu1 }
  0xae   :  { %337 = vst [vmem:[#allocation8] sm:$0xff] %v265_v57 }
  0xb2   :  { %v236_v58 = vpop.f32.mrf.mxu2 }
  0xb3   :  { %v285_v59 = vpop.f32.mrf.mxu3 }
  0xb4   :  { %345 = vst [vmem:[#allocation8 + $0x40] sm:$0xff] %v285_v59  ;;  %v218_v60 = vpop.f32.mrf.mxu0 }
  0xb5   :  { %v514_v61 = vpack.c.bf16 %v218_v60, %v216_v56  ;;  %v267_v62 = vpop.f32.mrf.mxu1 }
  0xb6   :  { %338 = vst [vmem:[#allocation8 + $0x8] sm:$0xff] %v267_v62 }
  0xb7   :  { %515 = vst [vmem:[#allocation7] sm:$0xff] %v514_v61  }
  0xba   :  { %v238_v63 = vpop.f32.mrf.mxu2 }
  0xbb   :  { %v534_v0 = vpack.c.bf16 %v238_v63, %v236_v58  ;;  %v287_v1 = vpop.f32.mrf.mxu3 }
  0xbc   :  { %346 = vst [vmem:[#allocation8 + $0x48] sm:$0xff] %v287_v1  ;;  %v221_v2 = vpop.f32.mrf.mxu0 }
  0xbd   :  { %554 = vst [vmem:[#allocation7 + $0x20] sm:$0xff] %v534_v0   ;;  %v270_v3 = vpop.f32.mrf.mxu1 }
  0xbe   :  { %339 = vst [vmem:[#allocation8 + $0x10] sm:$0xff] %v270_v3 }
  0xc2   :  { %v241_v4 = vpop.f32.mrf.mxu2 }
  0xc3   :  { %v290_v5 = vpop.f32.mrf.mxu3 }
  0xc4   :  { %347 = vst [vmem:[#allocation8 + $0x50] sm:$0xff] %v290_v5  ;;  %v223_v6 = vpop.f32.mrf.mxu0 }
  0xc5   :  { %v519_v7 = vpack.c.bf16 %v223_v6, %v221_v2  ;;  %v272_v8 = vpop.f32.mrf.mxu1 }
  0xc6   :  { %340 = vst [vmem:[#allocation8 + $0x18] sm:$0xff] %v272_v8 }
  0xc7   :  { %551 = vst [vmem:[#allocation7 + $0x8] sm:$0xff] %v519_v7  }
  0xca   :  { %v243_v9 = vpop.f32.mrf.mxu2 }
  0xcb   :  { %v539_v10 = vpack.c.bf16 %v243_v9, %v241_v4  ;;  %v292_v11 = vpop.f32.mrf.mxu3 }
  0xcc   :  { %348 = vst [vmem:[#allocation8 + $0x58] sm:$0xff] %v292_v11  ;;  %v226_v12 = vpop.f32.mrf.mxu0 }
  0xcd   :  { %555 = vst [vmem:[#allocation7 + $0x28] sm:$0xff] %v539_v10   ;;  %v275_v13 = vpop.f32.mrf.mxu1 }
  0xce   :  { %341 = vst [vmem:[#allocation8 + $0x20] sm:$0xff] %v275_v13 }
  0xd2   :  { %v246_v14 = vpop.f32.mrf.mxu2 }
  0xd3   :  { %v295_v15 = vpop.f32.mrf.mxu3 }
  0xd4   :  { %349 = vst [vmem:[#allocation8 + $0x60] sm:$0xff] %v295_v15  ;;  %v228_v16 = vpop.f32.mrf.mxu0 }
  0xd5   :  { %v524_v17 = vpack.c.bf16 %v228_v16, %v226_v12  ;;  %v277_v18 = vpop.f32.mrf.mxu1 }
  0xd6   :  { %342 = vst [vmem:[#allocation8 + $0x28] sm:$0xff] %v277_v18 }
  0xd7   :  { %552 = vst [vmem:[#allocation7 + $0x10] sm:$0xff] %v524_v17  }
  0xda   :  { %v248_v19 = vpop.f32.mrf.mxu2 }
  0xdb   :  { %v544_v20 = vpack.c.bf16 %v248_v19, %v246_v14  ;;  %v297_v21 = vpop.f32.mrf.mxu3 }
  0xdc   :  { %350 = vst [vmem:[#allocation8 + $0x68] sm:$0xff] %v297_v21  ;;  %v231_v22 = vpop.f32.mrf.mxu0 }
  0xdd   :  { %556 = vst [vmem:[#allocation7 + $0x30] sm:$0xff] %v544_v20   ;;  %v280_v23 = vpop.f32.mrf.mxu1 }
  0xde   :  { %343 = vst [vmem:[#allocation8 + $0x30] sm:$0xff] %v280_v23 }
  0xe2   :  { %v251_v24 = vpop.f32.mrf.mxu2 }
  0xe3   :  { %v300_v25 = vpop.f32.mrf.mxu3 }
  0xe4   :  { %351 = vst [vmem:[#allocation8 + $0x70] sm:$0xff] %v300_v25  ;;  %v233_v26 = vpop.f32.mrf.mxu0 }
  0xe5   :  { %v529_v27 = vpack.c.bf16 %v233_v26, %v231_v22  ;;  %v282_v28 = vpop.f32.mrf.mxu1 }
  0xe6   :  { %344 = vst [vmem:[#allocation8 + $0x38] sm:$0xff] %v282_v28 }
  0xe7   :  { %553 = vst [vmem:[#allocation7 + $0x18] sm:$0xff] %v529_v27  }
  0xea   :  { %v253_v29 = vpop.f32.mrf.mxu2 }
  0xeb   :  { %v549_v30 = vpack.c.bf16 %v253_v29, %v251_v24  ;;  %v302_v31 = vpop.f32.mrf.mxu3 }
  0xec   :  { %352 = vst [vmem:[#allocation8 + $0x78] sm:$0xff] %v302_v31 }
  0xed   :  { %557 = vst [vmem:[#allocation7 + $0x38] sm:$0xff] %v549_v30   ;;  %378 = dma.vmem_to_hbm [thread:$0]  %s371_s25, 2048, %s373_s28, [#allocation9], %s690_s24, %s690_s24, %s691_s0  }
  0xee   :  { %365 = dma.vmem_to_hbm [thread:$0]  %s358_s30, 1024, %s360_s6, [#allocation4], %s687_s20, %s687_s20, %s688_s21  }
  0xef   :  { %682 = dma.done.wait [#allocation4], 1024  }
  0xf0   :  { %683 = vsyncadd [#allocation4], 4294966272 }
  0xf1   :  { %684 = dma.done.wait [#allocation9], 2048  }
  0xf2   :  { %685 = vsyncadd [#allocation9], 4294965248 }
  0xf3   :  { %387 = vsyncpa [#allocation3], 1 }
  0xf4   :  { %388 = vsyncpa [#allocation6], 1 }
  0xf5   :  { %389 = vsyncpa [#allocation4], 1 }
  0xf6   :  { %390 = vsyncpa [#allocation9], 1 }

</bundles_post_ra>
